<compile_context>
chip_gen: v7x
topology: tpu7x:2x2x1
jax: 0.10.0
libtpu: 0.0.40
codegen_flags: <defaults>
</compile_context>

<pallas_src>
import functools

import jax
import jax.numpy as jnp
from jax.experimental import pallas as pl
from jax.experimental.pallas import tpu as pltpu

LANE = 128
SUBLANE = 8


def _cdiv(a, b):
    return -(-a // b)


def _default_num_slices():
    # Split across TensorCores only where there is >1 TC per device.
    # Falling back to 2 is always correct (just a tiny duplicate DMA on 1-TC).
    try:
        kind = jax.devices()[0].device_kind.lower()
    except Exception:
        return 2
    single_tc = any(t in kind for t in
                    ("v5 lite", "v5lite", "v5e", "v6 lite", "v6lite", "v6e"))
    return 1 if single_tc else 2


def _accuracy_kernel(yt_ref, yp_ref, out_ref, acc_ref, *,
                     tol, blocks_per_slice, total_blocks, tail_chunks):
    c = pl.program_id(0)   # slice (parallel across TensorCores where available)
    b = pl.program_id(1)   # block within slice (reduction axis)

    @pl.when(b == 0)
    def _init():
        acc_ref[...] = jnp.zeros_like(acc_ref)

    block_rows, lane = yt_ref.shape
    full_chunks = block_rows // SUBLANE
    blk = c * blocks_per_slice + b   # unclamped global block id

    def _count_chunks(n_chunks):
        # (8,128) one-vreg chunks; carried int32 accumulator keeps live ranges
        # to a few vregs and avoids any block_rows x 128 temporary.
        def body(i, acc):
            off = pl.multiple_of(i * SUBLANE, SUBLANE)
            yt = yt_ref[pl.ds(off, SUBLANE), :]
            yp = yp_ref[pl.ds(off, SUBLANE), :]
            return acc + (jnp.abs(yt - yp) < tol).astype(jnp.int32)

        init = jnp.zeros((SUBLANE, lane), jnp.int32)
        if n_chunks <= 0:
            return init
        return jax.lax.fori_loop(0, n_chunks, body, init,
                                 unroll=min(8, n_chunks))

    @pl.when(blk < total_blocks)       # skip clamped overhang blocks of slice 1
    def _accumulate():
        if tail_chunks == full_chunks:
            # block_rows divides the padded rows: every block is full (static).
            acc_ref[...] += _count_chunks(full_chunks)
        else:
            @pl.when(blk < total_blocks - 1)
            def _full():
                acc_ref[...] += _count_chunks(full_chunks)

            @pl.when(blk == total_blocks - 1)
            def _tail():
                # Valid portion of the last block is a whole number of (8,128)
                # chunks (static), so no per-element mask is needed.
                acc_ref[...] += _count_chunks(tail_chunks)

    @pl.when(b == pl.num_programs(1) - 1)
    def _finalize():
        # Lane-dense (8,128) int32 per-slice partials; reduced in the wrapper.
        out_ref[...] = acc_ref[...]


def accuracy(y_true, y_pred, tolerance=0.01, *, block_rows=8192, num_slices=None):
    yt = jnp.asarray(y_true, jnp.float32).reshape(-1)
    yp = jnp.asarray(y_pred, jnp.float32).reshape(-1)
    n_total = yt.shape[0]  # == y_true.shape[0] after torch.flatten

    # View the flat stream as (rows, 128); pad only the <1024-element remainder.
    rows = _cdiv(n_total, LANE)
    rows_padded = _cdiv(rows, SUBLANE) * SUBLANE
    pad = rows_padded * LANE - n_total
    if pad:
        # Sentinel padding: padded pairs can never be within `tolerance`,
        # so the kernel needs no per-element validity mask.
        sentinel = abs(float(tolerance)) * 2.0 + 1.0
        yt = jnp.pad(yt, (0, pad), constant_values=0.0)
        yp = jnp.pad(yp, (0, pad), constant_values=sentinel)
    yt2 = yt.reshape(rows_padded, LANE)
    yp2 = yp.reshape(rows_padded, LANE)

    # Tile sizing: default 8192x128 f32 = 4 MiB/input tile -> 16 MiB of
    # double-buffered input; vmem_limit_bytes below leaves headroom.
    block_rows = max(SUBLANE, min(int(block_rows), rows_padded))
    block_rows -= block_rows % SUBLANE
    total_blocks = _cdiv(rows_padded, block_rows)
    tail_rows = rows_padded - (total_blocks - 1) * block_rows  # multiple of 8

    if num_slices is None:
        num_slices = _default_num_slices()
    n_slices = int(num_slices) if total_blocks >= 2 else 1
    n_slices = max(1, min(n_slices, total_blocks))
    blocks_per_slice = _cdiv(total_blocks, n_slices)

    def data_index_map(c, b):
        blk = c * blocks_per_slice + b
        # Overhanging blocks of the last slice are clamped onto the final real
        # block; the kernel skips them with `pl.when(blk < total_blocks)`.
        return (jnp.minimum(blk, total_blocks - 1), 0)

    tile_bytes = block_rows * LANE * 4
    vmem_limit = max(40 << 20, 4 * tile_bytes + (8 << 20))

    kernel = functools.partial(
        _accuracy_kernel,
        tol=float(tolerance),
        blocks_per_slice=blocks_per_slice,
        total_blocks=total_blocks,
        tail_chunks=tail_rows // SUBLANE,
    )

    partials = pl.pallas_call(
        kernel,
        out_shape=jax.ShapeDtypeStruct((n_slices * SUBLANE, LANE), jnp.int32),
        grid=(n_slices, blocks_per_slice),
        in_specs=[
            pl.BlockSpec((block_rows, LANE), data_index_map),  # y_true tiles
            pl.BlockSpec((block_rows, LANE), data_index_map),  # y_pred tiles
        ],
        out_specs=pl.BlockSpec((SUBLANE, LANE), lambda c, b: (c, 0)),
        scratch_shapes=[pltpu.VMEM((SUBLANE, LANE), jnp.int32)],
        compiler_params=pltpu.CompilerParams(
            dimension_semantics=("parallel", "arbitrary"),
            vmem_limit_bytes=int(vmem_limit)),
    )(yt2, yp2)

    matches = jnp.sum(partials)  # exact int32 count
    return matches.astype(jnp.float32) / jnp.float32(n_total)


if __name__ == "__main__":
    key = jax.random.PRNGKey(0)
    k1, k2, k3 = jax.random.split(key, 3)

    # NCHW-shaped synthetic "segmentation" tensors.
    shape = (2, 4, 16, 16)
    y_true = jax.random.uniform(k1, shape, dtype=jnp.float32)
    noise = jax.random.uniform(k2, shape, dtype=jnp.float32) * 0.02
    mask = jax.random.bernoulli(k3, 0.5, shape)
    y_pred = y_true + jnp.where(mask, noise, 0.5 + noise)

    result = jax.block_until_ready(accuracy(y_true, y_pred, tolerance=0.01))
    ref = (jnp.abs(y_true.reshape(-1) - y_pred.reshape(-1)) < 0.01).sum() / y_true.size
    assert jnp.allclose(result, jnp.float32(ref), atol=1e-6), (result, ref)

    # Second case exercises sentinel padding, partial tail block, 2-slice
    # overhang skip and the clamped index map.
    k4, k5 = jax.random.split(k3)
    a = jax.random.uniform(k4, (5000,), dtype=jnp.float32)
    b = a + jax.random.uniform(k5, (5000,), dtype=jnp.float32) * 0.03
    r2 = jax.block_until_ready(
        accuracy(a, b, tolerance=0.02, block_rows=16, num_slices=2))
    ref2 = (jnp.abs(a - b) < 0.02).sum() / a.size
    assert jnp.allclose(r2, jnp.float32(ref2), atol=1e-6), (r2, ref2)

    print("KERNEL_OK")
</pallas_src>

<mosaic_0001>
module attributes {stable_mosaic.version = 11 : i64} {
  func.func @_accuracy_kernel(%arg0: i32, %arg1: i32, %arg2: memref<16x128xf32, #tpu.memory_space<vmem>>, %arg3: memref<16x128xf32, #tpu.memory_space<vmem>>, %arg4: memref<8x128xi32, #tpu.memory_space<vmem>>, %arg5: memref<8x128xi32, #tpu.memory_space<vmem>>) attributes {dimension_semantics = [#tpu.dimension_semantics<parallel>, #tpu.dimension_semantics<arbitrary>], iteration_bounds = array<i64: 1, 1>, scalar_prefetch = 0 : i64, scratch_operands = 1 : i64, tpu.core_type = #tpu.core_type<tc>, window_params = [{transform_indices = @transform_0, window_bounds = array<i64: 16, 128>}, {transform_indices = @transform_1, window_bounds = array<i64: 16, 128>}, {transform_indices = @transform_2, window_bounds = array<i64: 8, 128>}]} {
    %c0_i32 = arith.constant 0 : i32
    %0 = arith.cmpi eq, %arg1, %c0_i32 : i32
    %1 = arith.extui %0 : i1 to i32
    %c0_i32_0 = arith.constant 0 : i32
    %2 = arith.cmpi ne, %1, %c0_i32_0 : i32
    scf.if %2 {
      %c0_i32_5 = arith.constant 0 : i32
      %11 = vector.broadcast %c0_i32_5 : i32 to vector<8x128xi32>
      %c0 = arith.constant 0 : index
      %c0_6 = arith.constant 0 : index
      %12 = vector.load %arg5[%c0, %c0_6] : memref<8x128xi32, #tpu.memory_space<vmem>>, vector<8x128xi32>
      tpu.vector_store %arg5[%c0, %c0_6], %11 {strides = array<i32>} : memref<8x128xi32, #tpu.memory_space<vmem>>, vector<8x128xi32>,
    } else {
    }
    %c1_i32 = arith.constant 1 : i32
    %3 = arith.muli %arg0, %c1_i32 : i32
    %4 = arith.addi %3, %arg1 : i32
    %c1_i32_1 = arith.constant 1 : i32
    %5 = arith.cmpi slt, %4, %c1_i32_1 : i32
    %6 = arith.extui %5 : i1 to i32
    %c0_i32_2 = arith.constant 0 : i32
    %7 = arith.cmpi ne, %6, %c0_i32_2 : i32
    scf.if %7 {
      %c0 = arith.constant 0 : index
      %c0_5 = arith.constant 0 : index
      %11 = vector.load %arg5[%c0, %c0_5] : memref<8x128xi32, #tpu.memory_space<vmem>>, vector<8x128xi32>
      %c0_i32_6 = arith.constant 0 : i32
      %12 = vector.broadcast %c0_i32_6 : i32 to vector<8x128xi32>
      %c0_i32_7 = arith.constant 0 : i32
      %c8_i32 = arith.constant 8 : i32
      %13 = arith.muli %c0_i32_7, %c8_i32 : i32
      %14 = tpu.assume_multiple %13, 8 : i32
      %15 = arith.index_cast %14 : i32 to index
      %c0_8 = arith.constant 0 : index
      %16 = vector.load %arg2[%15, %c0_8] : memref<16x128xf32, #tpu.memory_space<vmem>>, vector<8x128xf32>
      %17 = arith.index_cast %14 : i32 to index
      %c0_9 = arith.constant 0 : index
      %18 = vector.load %arg3[%17, %c0_9] : memref<16x128xf32, #tpu.memory_space<vmem>>, vector<8x128xf32>
      %19 = arith.subf %16, %18 : vector<8x128xf32>
      %20 = math.absf %19 : vector<8x128xf32>
      %cst = arith.constant 0.00999999977 : f32
      %21 = vector.broadcast %cst : f32 to vector<8x128xf32>
      %22 = arith.cmpf olt, %20, %21 : vector<8x128xf32>
      %23 = arith.extui %22 : vector<8x128xi1> to vector<8x128xi32>
      %24 = arith.addi %12, %23 : vector<8x128xi32>
      %c1_i32_10 = arith.constant 1 : i32
      %c8_i32_11 = arith.constant 8 : i32
      %25 = arith.muli %c1_i32_10, %c8_i32_11 : i32
      %26 = tpu.assume_multiple %25, 8 : i32
      %27 = arith.index_cast %26 : i32 to index
      %c0_12 = arith.constant 0 : index
      %28 = vector.load %arg2[%27, %c0_12] : memref<16x128xf32, #tpu.memory_space<vmem>>, vector<8x128xf32>
      %29 = arith.index_cast %26 : i32 to index
      %c0_13 = arith.constant 0 : index
      %30 = vector.load %arg3[%29, %c0_13] : memref<16x128xf32, #tpu.memory_space<vmem>>, vector<8x128xf32>
      %31 = arith.subf %28, %30 : vector<8x128xf32>
      %32 = math.absf %31 : vector<8x128xf32>
      %cst_14 = arith.constant 0.00999999977 : f32
      %33 = vector.broadcast %cst_14 : f32 to vector<8x128xf32>
      %34 = arith.cmpf olt, %32, %33 : vector<8x128xf32>
      %35 = arith.extui %34 : vector<8x128xi1> to vector<8x128xi32>
      %36 = arith.addi %24, %35 : vector<8x128xi32>
      %c2_i32 = arith.constant 2 : i32
      %37 = arith.addi %11, %36 : vector<8x128xi32>
      %c0_15 = arith.constant 0 : index
      %c0_16 = arith.constant 0 : index
      %38 = vector.load %arg5[%c0_15, %c0_16] : memref<8x128xi32, #tpu.memory_space<vmem>>, vector<8x128xi32>
      tpu.vector_store %arg5[%c0_15, %c0_16], %37 {strides = array<i32>} : memref<8x128xi32, #tpu.memory_space<vmem>>, vector<8x128xi32>,
    } else {
    }
    %c0_i32_3 = arith.constant 0 : i32
    %8 = arith.cmpi eq, %arg1, %c0_i32_3 : i32
    %9 = arith.extui %8 : i1 to i32
    %c0_i32_4 = arith.constant 0 : i32
    %10 = arith.cmpi ne, %9, %c0_i32_4 : i32
    scf.if %10 {
      %c0 = arith.constant 0 : index
      %c0_5 = arith.constant 0 : index
      %11 = vector.load %arg5[%c0, %c0_5] : memref<8x128xi32, #tpu.memory_space<vmem>>, vector<8x128xi32>
      %c0_6 = arith.constant 0 : index
      %c0_7 = arith.constant 0 : index
      %12 = vector.load %arg4[%c0_6, %c0_7] : memref<8x128xi32, #tpu.memory_space<vmem>>, vector<8x128xi32>
      tpu.vector_store %arg4[%c0_6, %c0_7], %11 {strides = array<i32>} : memref<8x128xi32, #tpu.memory_space<vmem>>, vector<8x128xi32>,
    } else {
    }
    return
  }
  func.func @transform_0(%arg0: i32, %arg1: i32) -> (i32, i32) {
    %c1_i32 = arith.constant 1 : i32
    %0 = arith.muli %arg0, %c1_i32 : i32
    %1 = arith.addi %0, %arg1 : i32
    %c0_i32 = arith.constant 0 : i32
    %2 = arith.minsi %1, %c0_i32 : i32
    %c0_i32_0 = arith.constant 0 : i32
    %c0_i32_1 = arith.constant 0 : i32
    return %2, %c0_i32_0 : i32, i32
  }
  func.func @transform_1(%arg0: i32, %arg1: i32) -> (i32, i32) {
    %c1_i32 = arith.constant 1 : i32
    %0 = arith.muli %arg0, %c1_i32 : i32
    %1 = arith.addi %0, %arg1 : i32
    %c0_i32 = arith.constant 0 : i32
    %2 = arith.minsi %1, %c0_i32 : i32
    %c0_i32_0 = arith.constant 0 : i32
    %c0_i32_1 = arith.constant 0 : i32
    return %2, %c0_i32_0 : i32, i32
  }
  func.func @transform_2(%arg0: i32, %arg1: i32) -> (i32, i32) {
    %c0_i32 = arith.constant 0 : i32
    %c0_i32_0 = arith.constant 0 : i32
    return %arg0, %c0_i32 : i32, i32
  }
}

</mosaic_0001>

<bundles_post_ra>
// kernel: tpu_custom_call.1
= control target key start
LH: loop header
LB: loop body
LE: loop exit
PB: predicated region body
PF: predicated region fallthrough
CT: control target
= control target key end

     0   :  { %7 = vsyncpa [#allocation4], 0  ;;  %s248_s0 = inlined_call_operand.hbm [shape: f32[16,128], index: 0, kind: input, shape index: {}]   ;;  %s249_s1 = inlined_call_operand.hbm [shape: f32[16,128], index: 1, kind: input, shape index: {}]   ;;  %s250_s2 = inlined_call_operand.hbm [shape: s32[8,128], index: 2, kind: output, shape index: {}]  }
   0x1   :  { %8 = vsyncpa [#allocation7], 0 }
   0x2   :  { %9 = vsyncpa [#allocation5], 0  ;;  %s191_s9 = smov [#allocation3]   ;;  %s119_s13 = scalar_lea.hbm %s248_s0, 256 }
   0x3   :  { %s21_s10 = sshll.u32 %s191_s9, 4  ;;  %p120_p0 = scmp.ne.s32.totalorder %s248_s0, %s119_s13  ;;  %s22_s10 = int_to_ptr.vmem [resolvable:$true] %s21_s10 }
   0x4   :  { %p123_p1 = scmp.lt.u32.totalorder %s119_s13, %s248_s0 }
   0x6   :  { %p125_p2 = pnand %p123_p1, %p120_p0 }
   0x8   :  { %128 = shalt.err (!%p125_p2)
}
   0x9   :  { %s129_s18 = scalar_lea.vmem %s22_s10, 256  ;;  %p134_p4 = scmp.lt.s32.totalorder %s22_s10, %s22_s10 }
   0xa   :  { %p130_p3 = scmp.ne.s32.totalorder %s22_s10, %s129_s18  ;;  %p135_p5 = scmp.lt.s32.totalorder %s129_s18, %s129_s18 }
   0xc   :  { %p136_p6 = por %p135_p5, %p134_p4 }
   0xe   :  { %p137_p7 = pnand %p136_p6, %p130_p3 }
  0x10   :  { %140 = shalt.err (!%p137_p7)
}
  0x11   :  { %s192_s19 = smov 128   ;;  %s193_s20 = smov 8  }
  0x12   :  { %27 = dma.hbm_to_vmem [thread:$0]  %s248_s0, 256, %s22_s10, [#allocation4], %s192_s19, %s192_s19, %s193_s20  }
  0x13   :  { %s194_s23 = smov [#allocation6]   ;;  %s141_s27 = scalar_lea.hbm %s249_s1, 256 }
  0x14   :  { %s39_s24 = sshll.u32 %s194_s23, 4  ;;  %p142_p8 = scmp.ne.s32.totalorder %s249_s1, %s141_s27  ;;  %s40_s24 = int_to_ptr.vmem [resolvable:$true] %s39_s24 }
  0x15   :  { %p145_p9 = scmp.lt.u32.totalorder %s141_s27, %s249_s1 }
  0x17   :  { %p147_p10 = pnand %p145_p9, %p142_p8 }
  0x19   :  { %150 = shalt.err (!%p147_p10)
}
  0x1a   :  { %s151_s4 = scalar_lea.vmem %s40_s24, 256  ;;  %p156_p12 = scmp.lt.s32.totalorder %s40_s24, %s40_s24 }
  0x1b   :  { %p152_p11 = scmp.ne.s32.totalorder %s40_s24, %s151_s4  ;;  %p157_p13 = scmp.lt.s32.totalorder %s151_s4, %s151_s4 }
  0x1d   :  { %p158_p0 = por %p157_p13, %p156_p12 }
  0x1f   :  { %p159_p1 = pnand %p158_p0, %p152_p11 }
  0x21   :  { %162 = shalt.err (!%p159_p1)
}
  0x22   :  { %45 = dma.hbm_to_vmem [thread:$0]  %s249_s1, 256, %s40_s24, [#allocation7], %s192_s19, %s192_s19, %s193_s20  }
  0x23   :  { %185 = dma.done.wait [#allocation4], 256  }
  0x24   :  { %186 = vsyncadd [#allocation4], 4294967040 }
  0x25   :  { %187 = dma.done.wait [#allocation7], 256  }
  0x26   :  { %188 = vsyncadd [#allocation7], 4294967040  ;;  %v71_v0 = vld [vmem:[#allocation3] sm:$0xff]  ;;  %v72_v1 = vld [vmem:[#allocation6] sm:$0xff]  ;;  %s195_s6 = smov [#allocation8]   ;;  %v196_v8 = vmov 0  }
  0x27   :  { %v78_v2 = vld [vmem:[#allocation3 + $0x8] sm:$0xff]  ;;  %v73_v3 = vsub.f32 %v71_v0, %v72_v1  ;;  %v80_v4 = vld [vmem:[#allocation6 + $0x8] sm:$0xff]  ;;  %s99_s7 = sshll.u32 %s195_s6, 4  ;;  %s100_s7 = int_to_ptr.vmem [resolvable:$true] %s99_s7 }
  0x28   :  { %v81_v5 = vsub.f32 %v78_v2, %v80_v4  ;;  %s163_s1 = scalar_lea.vmem %s100_s7, 128  ;;  %p168_p3 = scmp.lt.s32.totalorder %s100_s7, %s100_s7 }
  0x29   :  { %v74_v6 = vand.u32 2147483647, %v73_v3  ;;  %p164_p2 = scmp.ne.s32.totalorder %s100_s7, %s163_s1  ;;  %p169_p4 = scmp.lt.s32.totalorder %s163_s1, %s163_s1 }
  0x2a   :  { %v82_v7 = vand.u32 2147483647, %v81_v5 }
  0x2b   :  { %vm75_vm0 = vcmp.lt.f32.partialorder %v74_v6, 0.01  ;;  %p170_p5 = por %p169_p4, %p168_p3 }
  0x2c   :  { %v76_v9 = vsel %vm75_vm0, 1, %v196_v8  ;;  %vm83_vm1 = vcmp.lt.f32.partialorder %v82_v7, 0.01 }
  0x2d   :  { %v84_v10 = vsel %vm83_vm1, 1, %v196_v8  ;;  %p171_p6 = pnand %p170_p5, %p164_p2 }
  0x2e   :  { %v85_v11 = vadd.s32 %v84_v10, %v76_v9 }
  0x30   :  { %92 = vst [vmem:[#allocation8] sm:$0xff] %v85_v11 }
  0x31   :  { %174 = shalt.err (!%p171_p6)
}
  0x32   :  { %s175_s10 = scalar_lea.hbm %s250_s2, 128 }
  0x33   :  { %p176_p7 = scmp.ne.s32.totalorder %s250_s2, %s175_s10  ;;  %p179_p8 = scmp.lt.u32.totalorder %s175_s10, %s250_s2 }
  0x35   :  { %p181_p9 = pnand %p179_p8, %p176_p7 }
  0x37   :  { %184 = shalt.err (!%p181_p9)
}
  0x38   :  { %102 = dma.vmem_to_hbm [thread:$0]  %s100_s7, 128, %s250_s2, [#allocation5]  }
  0x39   :  { %189 = dma.done.wait [#allocation5], 128  }
  0x3a   :  { %190 = vsyncadd [#allocation5], 4294967168 }
  0x3b   :  { %106 = vsyncpa [#allocation4], 1 }
  0x3c   :  { %107 = vsyncpa [#allocation7], 1 }
  0x3d   :  { %108 = vsyncpa [#allocation5], 1 }

</bundles_post_ra>
